<compile_context>
chip_gen: v7x
topology: tpu7x:2x2x1
jax: 0.10.0
libtpu: 0.0.40
codegen_flags: <defaults>
</compile_context>

<pallas_src>
import functools

import jax
import jax.numpy as jnp
from jax.experimental import pallas as pl
from jax.experimental.pallas import tpu as pltpu


def _round_up(x: int, m: int) -> int:
    return ((x + m - 1) // m) * m


def _pos_linear_kernel(x_ref, w_ref, b_ref, o_ref):
    """One (tm, tn) output tile; accumulates over the K grid axis directly in o_ref."""
    k = pl.program_id(2)

    # Zero the resident f32 output block on the first K step.
    @pl.when(k == 0)
    def _():
        o_ref[...] = jnp.zeros_like(o_ref)

    # |W| on bf16 vregs (sign-bit clear, cheap filler under the MXU slot);
    # MXU takes bf16 operands, accumulation is f32 directly into o_ref, which
    # stays resident in VMEM across the whole K axis (out index_map ignores k).
    o_ref[...] += jnp.dot(x_ref[...], jnp.abs(w_ref[...]),
                          preferred_element_type=jnp.float32)

    # Add the bias once, on the last K step.
    @pl.when(k == pl.num_programs(2) - 1)
    def _():
        o_ref[...] += b_ref[...]


def _pick_tiles(B, K, N, tm, tn, tk):
    # Small-batch aware tm (bf16 packs 16 rows per vreg); divisible by 8.
    tm = min(tm, _round_up(B, 16))
    # One K step when it fits; otherwise tk must be a multiple of 128.
    tk = K if K <= tk else tk
    # Full-N tile when it fits; otherwise tn must be a multiple of 128.
    tn = N if N <= tn else tn
    # v7x megacore: keep >= 2 blocks on the parallel (M x N) axes when possible.
    if pl.cdiv(B, tm) == 1 and pl.cdiv(N, tn) == 1 and N >= 256:
        tn = _round_up(pl.cdiv(N, 2), 128)
    return tm, tn, tk


@functools.partial(jax.jit, static_argnames=("tm", "tn", "tk"))
def pos_linear(x, weight, bias, *, tm=256, tn=512, tk=1024):
    """y = x @ |weight| + bias   (PyTorch PosLinear forward).

    x: (B, K) f32, weight: (K, N) f32, bias: (N,) f32 -> (B, N) f32.

    VMEM at the default tiles (bf16 inputs double-buffered + f32 output block):
      2*(tm*tk + tk*tn)*2B + 2*tm*tn*4B ~= 4 MiB, well inside the explicit
      32 MiB scoped-VMEM limit on v5e/v6e/v7x.
    """
    B, K = x.shape
    Kw, N = weight.shape
    assert K == Kw and bias.shape == (N,)

    tm, tn, tk = _pick_tiles(B, K, N, tm, tn, tk)

    # bf16 operands for the MXU; abs stays in-kernel (|cast(w)| == cast(|w|)).
    # Only K is padded: M/N overhang feeds discarded stores, K tail would not.
    # TODO(synk): hoist the weight cast/pad out of the per-call path when the
    # weight is a static parameter (it is redone under jit on every call here).
    x_b = x.astype(jnp.bfloat16)
    w_b = weight.astype(jnp.bfloat16)
    Kp = _round_up(K, tk)
    if Kp != K:
        x_b = jnp.pad(x_b, ((0, 0), (0, Kp - K)))
        w_b = jnp.pad(w_b, ((0, Kp - K), (0, 0)))
    b2d = bias.astype(jnp.float32).reshape(1, N)

    grid = (pl.cdiv(B, tm), pl.cdiv(N, tn), Kp // tk)

    return pl.pallas_call(
        _pos_linear_kernel,
        out_shape=jax.ShapeDtypeStruct((B, N), jnp.float32),
        grid_spec=pltpu.PrefetchScalarGridSpec(
            num_scalar_prefetch=0,
            grid=grid,
            in_specs=[
                pl.BlockSpec((tm, tk), lambda i, j, k: (i, k)),   # x tile (bf16)
                # If the W-tile DMA is exposed on short K grids, try
                # pipeline_mode=pl.Buffered(3) here and sweep.
                pl.BlockSpec((tk, tn), lambda i, j, k: (k, j)),   # W tile (bf16)
                pl.BlockSpec((1, tn), lambda i, j, k: (0, j)),    # bias tile (f32)
            ],
            out_specs=pl.BlockSpec((tm, tn), lambda i, j, k: (i, j)),
        ),
        compiler_params=pltpu.CompilerParams(
            # M/N shard across TensorCores on v7x; K is the reduction axis.
            dimension_semantics=("parallel", "parallel", "arbitrary"),
            # Explicit budget: raises v5e's 16 MiB scoped default, matches v6e/v7x.
            vmem_limit_bytes=32 * 1024 * 1024,
        ),
    )(x_b, w_b, b2d)


if __name__ == "__main__":
    key = jax.random.PRNGKey(0)
    kx, kw, kb = jax.random.split(key, 3)

    # Case 1: small single-tile problem (module-sized example).
    batch, in_dim, out_dim = 8, 32, 64
    x = jax.random.normal(kx, (batch, in_dim), dtype=jnp.float32)
    # Deterministic parameter init (synthetic — module __init__ leaves them uninitialized).
    weight = jax.random.normal(kw, (in_dim, out_dim), dtype=jnp.float32) * 0.1
    bias = jax.random.normal(kb, (out_dim,), dtype=jnp.float32) * 0.1

    out = pos_linear(x, weight, bias)
    jax.block_until_ready(out)
    ref = jnp.matmul(x, jnp.abs(weight)) + bias
    assert out.shape == (batch, out_dim)
    # bf16 MXU operands with f32 accumulation -> bf16-level tolerance.
    assert jnp.allclose(out, ref, atol=3e-2, rtol=3e-2)

    # Case 2: multi-tile problem exercising K accumulation (3 K steps) and
    # multiple N tiles (megacore split), still small.
    b2, k2, n2 = 8, 384, 256
    x2 = jax.random.normal(kx, (b2, k2), dtype=jnp.float32)
    w2 = jax.random.normal(kw, (k2, n2), dtype=jnp.float32) * 0.1
    bias2 = jax.random.normal(kb, (n2,), dtype=jnp.float32) * 0.1

    out2 = pos_linear(x2, w2, bias2, tk=128)  # force num_programs(K) == 3
    jax.block_until_ready(out2)
    ref2 = jnp.matmul(x2, jnp.abs(w2)) + bias2
    assert out2.shape == (b2, n2)
    assert jnp.allclose(out2, ref2, atol=5e-2, rtol=5e-2)

    print("KERNEL_OK")
</pallas_src>

<mosaic_0001>
module attributes {stable_mosaic.version = 11 : i64} {
  func.func @_pos_linear_kernel(%arg0: i32, %arg1: i32, %arg2: i32, %arg3: memref<16x32xbf16, #tpu.memory_space<vmem>>, %arg4: memref<32x64xbf16, #tpu.memory_space<vmem>>, %arg5: memref<1x64xf32, #tpu.memory_space<vmem>>, %arg6: memref<16x64xf32, #tpu.memory_space<vmem>>) attributes {dimension_semantics = [#tpu.dimension_semantics<parallel>, #tpu.dimension_semantics<parallel>, #tpu.dimension_semantics<arbitrary>], iteration_bounds = array<i64: 1, 1, 1>, scalar_prefetch = 0 : i64, scratch_operands = 0 : i64, tpu.core_type = #tpu.core_type<tc>, window_params = [{transform_indices = @transform_0, window_bounds = array<i64: 16, 32>}, {transform_indices = @transform_1, window_bounds = array<i64: 32, 64>}, {transform_indices = @transform_2, window_bounds = array<i64: 1, 64>}, {transform_indices = @transform_3, window_bounds = array<i64: 16, 64>}]} {
    %c0_i32 = arith.constant 0 : i32
    %0 = arith.cmpi eq, %arg2, %c0_i32 : i32
    %1 = arith.extui %0 : i1 to i32
    %c0_i32_0 = arith.constant 0 : i32
    %2 = arith.cmpi ne, %1, %c0_i32_0 : i32
    scf.if %2 {
      %cst_10 = arith.constant 0.000000e+00 : f32
      %13 = vector.broadcast %cst_10 : f32 to vector<16x64xf32>
      %c0_11 = arith.constant 0 : index
      %c0_12 = arith.constant 0 : index
      %14 = vector.load %arg6[%c0_11, %c0_12] : memref<16x64xf32, #tpu.memory_space<vmem>>, vector<16x64xf32>
      tpu.vector_store %arg6[%c0_11, %c0_12], %13 {strides = array<i32>} : memref<16x64xf32, #tpu.memory_space<vmem>>, vector<16x64xf32>,
    } else {
    }
    %c0 = arith.constant 0 : index
    %c0_1 = arith.constant 0 : index
    %3 = vector.load %arg6[%c0, %c0_1] : memref<16x64xf32, #tpu.memory_space<vmem>>, vector<16x64xf32>
    %c0_2 = arith.constant 0 : index
    %c0_3 = arith.constant 0 : index
    %4 = vector.load %arg3[%c0_2, %c0_3] : memref<16x32xbf16, #tpu.memory_space<vmem>>, vector<16x32xbf16>
    %c0_4 = arith.constant 0 : index
    %c0_5 = arith.constant 0 : index
    %5 = vector.load %arg4[%c0_4, %c0_5] : memref<32x64xbf16, #tpu.memory_space<vmem>>, vector<32x64xbf16>
    %6 = math.absf %5 : vector<32x64xbf16>
    %cst = arith.constant dense<0.000000e+00> : vector<16x64xf32>
    %7 = tpu.matmul %4, %6, %cst {dimension_numbers = #tpu.dot_dimension_numbers<[1], [0], [0], [1], [0, 0, 1, 1], [], []>} : vector<16x32xbf16>, vector<32x64xbf16>, vector<16x64xf32> -> vector<16x64xf32>
    %8 = arith.addf %3, %7 : vector<16x64xf32>
    %c0_6 = arith.constant 0 : index
    %c0_7 = arith.constant 0 : index
    %9 = vector.load %arg6[%c0_6, %c0_7] : memref<16x64xf32, #tpu.memory_space<vmem>>, vector<16x64xf32>
    tpu.vector_store %arg6[%c0_6, %c0_7], %8 {strides = array<i32>} : memref<16x64xf32, #tpu.memory_space<vmem>>, vector<16x64xf32>,
    %c0_i32_8 = arith.constant 0 : i32
    %10 = arith.cmpi eq, %arg2, %c0_i32_8 : i32
    %11 = arith.extui %10 : i1 to i32
    %c0_i32_9 = arith.constant 0 : i32
    %12 = arith.cmpi ne, %11, %c0_i32_9 : i32
    scf.if %12 {
      %c0_10 = arith.constant 0 : index
      %c0_11 = arith.constant 0 : index
      %13 = vector.load %arg6[%c0_10, %c0_11] : memref<16x64xf32, #tpu.memory_space<vmem>>, vector<16x64xf32>
      %c0_12 = arith.constant 0 : index
      %c0_13 = arith.constant 0 : index
      %14 = vector.load %arg5[%c0_12, %c0_13] : memref<1x64xf32, #tpu.memory_space<vmem>>, vector<1x64xf32>
      %15 = vector.broadcast %14 : vector<1x64xf32> to vector<16x64xf32>
      %16 = arith.addf %13, %15 : vector<16x64xf32>
      %c0_14 = arith.constant 0 : index
      %c0_15 = arith.constant 0 : index
      %17 = vector.load %arg6[%c0_14, %c0_15] : memref<16x64xf32, #tpu.memory_space<vmem>>, vector<16x64xf32>
      tpu.vector_store %arg6[%c0_14, %c0_15], %16 {strides = array<i32>} : memref<16x64xf32, #tpu.memory_space<vmem>>, vector<16x64xf32>,
    } else {
    }
    return
  }
  func.func @transform_0(%arg0: i32, %arg1: i32, %arg2: i32) -> (i32, i32) {
    %c0_i32 = arith.constant 0 : i32
    return %arg0, %arg2 : i32, i32
  }
  func.func @transform_1(%arg0: i32, %arg1: i32, %arg2: i32) -> (i32, i32) {
    %c0_i32 = arith.constant 0 : i32
    return %arg2, %arg1 : i32, i32
  }
  func.func @transform_2(%arg0: i32, %arg1: i32, %arg2: i32) -> (i32, i32) {
    %c0_i32 = arith.constant 0 : i32
    %c0_i32_0 = arith.constant 0 : i32
    return %c0_i32, %arg1 : i32, i32
  }
  func.func @transform_3(%arg0: i32, %arg1: i32, %arg2: i32) -> (i32, i32) {
    %c0_i32 = arith.constant 0 : i32
    return %arg0, %arg1 : i32, i32
  }
}

</mosaic_0001>

<bundles_post_ra>
// kernel: pos_linear.1
= control target key start
LH: loop header
LB: loop body
LE: loop exit
PB: predicated region body
PF: predicated region fallthrough
CT: control target
= control target key end

     0   :  { %8 = vsyncpa [#allocation3], 0  ;;  %v180_v1 = vmov 0.0   ;;  %vm181_vm0 = vmmov 0   ;;  %vm20_vm1 = vcmask 523264   ;;  %vm52_vm2 = vcmask 261120   ;;  %s241_s0 = inlined_call_operand.vmem [shape: bf16[8,32], index: 0, kind: input, shape index: {}]   ;;  %s242_s1 = inlined_call_operand.vmem [shape: bf16[32,64], index: 1, kind: input, shape index: {}]   ;;  %s243_s2 = inlined_call_operand.vmem [shape: f32[1,64], index: 2, kind: input, shape index: {}]   ;;  %s244_s3 = inlined_call_operand.hbm [shape: f32[8,64], index: 3, kind: output, shape index: {}]  }
   0x1   :  { %v27_v0 = vld [vmem:[%s242_s1] sm:$0xf]  ;;  %142 = vmatprep.subr.bf16.mxu0 %v180_v1  ;;  %v28_v2 = vld [vmem:[%s242_s1 + $0x4] sm:$0xf]  ;;  %v29_v4 = vld [vmem:[%s242_s1 + $0x8] sm:$0xf]  ;;  %146 = vmatprep.mubr.msk.bf16.mxu0 %vm181_vm0, %v180_v1 }
   0x2   :  { %v31_v3 = vand.u32 2147450879, %v27_v0  ;;  %v32_v5 = vand.u32 2147450879, %v28_v2  ;;  %v30_v6 = vld [vmem:[%s242_s1 + $0xc] sm:$0xf] }
   0x3   :  { %v33_v7 = vand.u32 2147450879, %v29_v4  ;;  %v34_v8 = vand.u32 2147450879, %v30_v6  ;;  %21 = vst.msk [vmem:[#allocation2] sm:$0xff] %vm20_vm1, %v180_v1  ;;  %22 = vst.msk [vmem:[#allocation2 + $0x8] sm:$0xff] %vm20_vm1, %v180_v1 }
   0x4   :  { %v135_v9 = vcombine.low %v31_v3, %v32_v5  ;;  %v155_v11 = vld [vmem:[%s241_s0] sm:$0xff]  }
   0x5   :  { %v136_v10 = vcombine.low %v33_v7, %v34_v8  ;;  %v138_v20 = vld [vmem:[%s243_s2] ss:$0 sm:$0xff] }
   0x6   :  { %143 = vmatpush3.bf16.msra.mxu0 %v135_v9 }
   0x7   :  { %144 = vmatprep.subr.bf16.mxu0 %v180_v1 }
   0xa   :  { %145 = vmatpush3.bf16.msra.mxu0 %v136_v10  ;;  %v23_v12 = vld [vmem:[#allocation2] sm:$0xff]  ;;  %v24_v14 = vld [vmem:[#allocation2 + $0x8] sm:$0xff] }
   0xd   :  { %147 = vmatmul.mubr.msk.bf16.vlgmr.msra.gmra.mrb[0].mxu0 %vm52_vm2, %v155_v11 }
  0xe0   :  { %v90_v13 = vpop.f32.mrb[0].mxu0 }
  0xe1   :  { %v97_v15 = vadd.f32 %v90_v13, %v23_v12  ;;  %v148_v16 = vpop.f32.mrb[1].mxu0 }
  0xe2   :  { %v93_v17 = vpop.f32.mrb[2].mxu0 }
  0xe3   :  { %100 = vst.msk [vmem:[#allocation2] sm:$0xff] %vm20_vm1, %v97_v15  ;;  %v98_v18 = vadd.f32 %v93_v17, %v24_v14  ;;  %v149_v19 = vpop.f32.mrb[3].mxu0 }
  0xe5   :  { %101 = vst.msk [vmem:[#allocation2 + $0x8] sm:$0xff] %vm20_vm1, %v98_v18 }
  0xea   :  { %v105_v21 = vld [vmem:[#allocation2] sm:$0xff] }
  0xeb   :  { %v114_v22 = vadd.f32 %v138_v20, %v105_v21 }
  0xec   :  { %v106_v23 = vld [vmem:[#allocation2 + $0x8] sm:$0xff] }
  0xed   :  { %116 = vst.msk [vmem:[#allocation2] sm:$0xff] %vm20_vm1, %v114_v22  ;;  %v115_v24 = vadd.f32 %v138_v20, %v106_v23 }
  0xef   :  { %117 = vst.msk [vmem:[#allocation2 + $0x8] sm:$0xff] %vm20_vm1, %v115_v24 }
  0xf0   :  { %122 = vsyncadd [#allocation3], 128  ;;  %s182_s0 = smov [#allocation2]  }
  0xf1   :  { %s123_s23 = sshll.u32 %s182_s0, 4  ;;  %s124_s23 = int_to_ptr.vmem [resolvable:$true] %s123_s23 }
  0xf2   :  { %s156_s24 = scalar_lea.vmem %s124_s23, 128  ;;  %s160_s25 = scalar_lea.vmem %s124_s23, 256 }
  0xf3   :  { %p157_p0 = scmp.ne.s32.totalorder %s124_s23, %s156_s24  ;;  %p161_p1 = scmp.lt.s32.totalorder %s124_s23, %s124_s23 }
  0xf4   :  { %p162_p2 = scmp.lt.s32.totalorder %s160_s25, %s156_s24 }
  0xf6   :  { %p163_p3 = por %p162_p2, %p161_p1 }
  0xf8   :  { %p164_p4 = pnand %p163_p3, %p157_p0 }
  0xfa   :  { %167 = shalt.err (!%p164_p4)
}
  0xfb   :  { %s168_s27 = scalar_lea.hbm %s244_s3, 128 }
  0xfc   :  { %p169_p5 = scmp.ne.s32.totalorder %s244_s3, %s168_s27  ;;  %p172_p6 = scmp.lt.u32.totalorder %s168_s27, %s244_s3 }
  0xfe   :  { %p174_p7 = pnand %p172_p6, %p169_p5 }
 0x100   :  { %177 = shalt.err (!%p174_p7)
}
 0x101   :  { %s183_s5 = smov 128   ;;  %s184_s6 = smov 8  }
 0x102   :  { %129 = dma.vmem_to_hbm [thread:$0]  %s124_s23, 128, %s244_s3, [#allocation3], %s183_s5, %s183_s5, %s184_s6  }
 0x103   :  { %178 = dma.done.wait [#allocation3], 256  }
 0x104   :  { %179 = vsyncadd [#allocation3], 4294967040 }
 0x105   :  { %133 = vsyncpa [#allocation3], 1 }

</bundles_post_ra>
